<compile_context>
chip_gen: v6e
topology: v6e:2x2x1
jax: 0.10.0
libtpu: 0.0.40
codegen_flags: <defaults>
</compile_context>

<pallas_src>
import jax
import jax.numpy as jnp
from jax.experimental import pallas as pl
from jax.experimental.pallas import tpu as pltpu


def _make_dwconv_bn_relu_kernel(C):
    """Kernel factory; C (channels) is closed over as a static constant."""

    def kernel(x_ref, w_ref, b_ref, o_ref):
        """Depthwise 3x3 conv + folded BN + ReLU on a lane-fused (W*C) layout.

        x_ref: (nb, H, W*C)  unpadded input, W and C fused on the lane axis
        w_ref: (9, W*C)      BN-folded, boundary-masked depthwise weights
        b_ref: (1, W*C)      folded BN bias
        o_ref: (nb, H, W*C)  output block
        """
        nb, H, WC = o_ref.shape
        x = x_ref[...].astype(jnp.float32)                      # (nb, H, WC)

        # H-direction neighbors: zero halo built by slice + zero-row concat
        # (pure sublane shifts, boundary zeros included -- no masks needed).
        zrow = jnp.zeros((nb, 1, WC), jnp.float32)
        x_hm = jnp.concatenate([zrow, x[:, :H - 1, :]], axis=1)  # [h] = x[h-1]
        x_hp = jnp.concatenate([x[:, 1:, :], zrow], axis=1)      # [h] = x[h+1]

        # Accumulator starts at the folded BN bias (saves one add pass).
        acc = jnp.broadcast_to(b_ref[0, :].astype(jnp.float32), (nb, H, WC))

        # W-direction neighbors: one lane roll by +/-C per h-plane.  The
        # wrapped boundary lanes contribute zero because the kw=0 / kw=2
        # weight rows were zero-masked there in the wrapper.
        for kh, xh in enumerate((x_hm, x, x_hp)):
            taps = (
                pltpu.roll(xh, shift=C, axis=2),        # kw=0 -> x[.., w-1]
                xh,                                      # kw=1 -> x[.., w]
                pltpu.roll(xh, shift=WC - C, axis=2),    # kw=2 -> x[.., w+1]
            )
            for kw, tap in enumerate(taps):
                acc = acc + tap * w_ref[kh * 3 + kw, :].astype(jnp.float32)

        o_ref[...] = jnp.maximum(acc, 0.0).astype(o_ref.dtype)

    return kernel


def _auto_batch_block(N, H, WC, budget_bytes=8 << 20):
    """Largest divisor of N whose double-buffered f32 in+out fits the budget.

    Budget is conservative (8 MiB) so the same choice is safe under v5e's
    16 MiB default scoped VMEM, v6e's 32 MiB and v7x's 64 MiB physical VMEM.
    """
    per_item = 2 * 2 * 4 * H * WC          # (in + out) x double-buffer x f32
    nb = N
    while nb > 1 and nb * per_item > budget_bytes:
        nb -= 1
        while N % nb:
            nb -= 1
    return nb


def motif_1_2_forward(x_nchw, dw_weight, gamma, beta, running_mean, running_var,
                      eps=1e-5, batch_block=None):
    """x_nchw: (N, C, H, W) float32; dw_weight: (C, 1, 3, 3) (PyTorch layout).

    batch_block: batch elements per grid step.  Default (None) collapses the
    grid to a single step on single-TC chips (v5e/v6e).  On v7x pass
    batch_block = N // 2 so each TensorCore gets one "parallel" step.
    """
    N, C, H, W = x_nchw.shape
    WC = W * C
    if batch_block is None:
        batch_block = _auto_batch_block(N, H, WC)
    nb = batch_block
    assert N % nb == 0, "batch_block must divide N"

    # --- BN folding (eval mode): y = conv(x) * scale + bias -----------------
    scale = (gamma / jnp.sqrt(running_var + eps)).astype(jnp.float32)    # (C,)
    bias = (beta - running_mean * scale).astype(jnp.float32)             # (C,)

    # Fold BN scale into the depthwise weights, tile over W so each tap is a
    # dense (W*C,) lane vector, and fold the W-boundary zeros of the conv
    # padding into the kw=0 / kw=2 rows (so the kernel needs no lane masks).
    w = jnp.transpose(dw_weight[:, 0, :, :], (1, 2, 0)).astype(jnp.float32)  # (3,3,C)
    w_tiled = jnp.tile(w * scale, (1, 1, W))                                 # (3,3,W*C)
    wcol = jnp.arange(WC) // C                                               # output w per lane
    kw_mask = jnp.stack([
        (wcol >= 1),                     # kw=0 reads w-1: invalid at w == 0
        jnp.ones((WC,), dtype=bool),     # kw=1
        (wcol <= W - 2),                 # kw=2 reads w+1: invalid at w == W-1
    ], axis=0).astype(jnp.float32)                                           # (3, W*C)
    w_fused = (w_tiled * kw_mask[None, :, :]).reshape(9, WC)                 # (9, W*C)
    b_fused = jnp.tile(bias, W).reshape(1, WC)                               # (1, W*C)

    # --- lane-dense relayout: NCHW -> NHWC -> fuse (W, C) onto lanes --------
    # Single relayout pass; no jnp.pad (halo is synthesized in-kernel).
    x_fused = jnp.transpose(x_nchw, (0, 2, 3, 1)).reshape(N, H, WC)

    flops = (2 * 9 + 2) * N * H * W * C
    bytes_accessed = 4 * (x_fused.size + N * H * WC + w_fused.size + b_fused.size)

    out_fused = pl.pallas_call(
        _make_dwconv_bn_relu_kernel(C),
        out_shape=jax.ShapeDtypeStruct((N, H, WC), x_nchw.dtype),
        grid_spec=pltpu.PrefetchScalarGridSpec(
            num_scalar_prefetch=0,
            grid=(N // nb,),
            in_specs=[
                pl.BlockSpec((nb, H, WC), lambda b: (b, 0, 0)),
                pl.BlockSpec((9, WC), lambda b: (0, 0)),
                pl.BlockSpec((1, WC), lambda b: (0, 0)),
            ],
            out_specs=pl.BlockSpec((nb, H, WC), lambda b: (b, 0, 0)),
        ),
        compiler_params=pltpu.CompilerParams(
            dimension_semantics=("parallel",)),
        cost_estimate=pl.CostEstimate(flops=flops, transcendentals=0,
                                      bytes_accessed=bytes_accessed),
    )(x_fused, w_fused, b_fused)

    # Un-fuse lanes and return PyTorch's NCHW convention.
    return jnp.transpose(out_fused.reshape(N, H, W, C), (0, 3, 1, 2))


def motif_1_2_reference(x_nchw, dw_weight, gamma, beta, running_mean,
                        running_var, eps=1e-5):
    """Pure-JAX reference (NCHW, mirrors PyTorch eval-mode forward)."""
    C = x_nchw.shape[1]
    y = jax.lax.conv_general_dilated(
        x_nchw, dw_weight, window_strides=(1, 1), padding=((1, 1), (1, 1)),
        dimension_numbers=("NCHW", "OIHW", "NCHW"), feature_group_count=C)
    s = (gamma / jnp.sqrt(running_var + eps)).reshape(1, C, 1, 1)
    b = (beta - running_mean * gamma / jnp.sqrt(running_var + eps)
         ).reshape(1, C, 1, 1)
    return jnp.maximum(y * s + b, 0.0)


if __name__ == "__main__":
    # Shapes implied by the module: in_channels = c0 = 16; small batch/spatial.
    N, C, H, W = 2, 16, 16, 16

    key = jax.random.PRNGKey(0)
    kx, kw, kg, kb, km, kv = jax.random.split(key, 6)

    x = jax.random.normal(kx, (N, C, H, W), dtype=jnp.float32)
    # Depthwise conv weight: PyTorch shape (C, 1, 3, 3), bias=False.
    dw_weight = 0.1 * jax.random.normal(kw, (C, 1, 3, 3), dtype=jnp.float32)
    # BatchNorm2d parameters (deterministic, non-trivial).
    gamma = 1.0 + 0.1 * jax.random.normal(kg, (C,), dtype=jnp.float32)
    beta = 0.1 * jax.random.normal(kb, (C,), dtype=jnp.float32)
    running_mean = 0.1 * jax.random.normal(km, (C,), dtype=jnp.float32)
    running_var = 1.0 + 0.1 * jax.random.uniform(kv, (C,), dtype=jnp.float32)

    out = motif_1_2_forward(x, dw_weight, gamma, beta, running_mean,
                            running_var)
    out = jax.block_until_ready(out)

    ref = motif_1_2_reference(x, dw_weight, gamma, beta, running_mean,
                              running_var)
    assert out.shape == (N, C, H, W)
    assert jnp.allclose(out, ref, atol=1e-4, rtol=1e-4)

    print("KERNEL_OK")
</pallas_src>

<mosaic_0001>
module attributes {stable_mosaic.version = 11 : i64} {
  func.func @kernel(%arg0: i32, %arg1: memref<2x16x256xf32, #tpu.memory_space<vmem>>, %arg2: memref<9x256xf32, #tpu.memory_space<vmem>>, %arg3: memref<1x256xf32, #tpu.memory_space<vmem>>, %arg4: memref<2x16x256xf32, #tpu.memory_space<vmem>>) attributes {dimension_semantics = [#tpu.dimension_semantics<parallel>], iteration_bounds = array<i64: 1>, scalar_prefetch = 0 : i64, scratch_operands = 0 : i64, tpu.core_type = #tpu.core_type<tc>, window_params = [{transform_indices = @transform_0, window_bounds = array<i64: 2, 16, 256>}, {pipeline_mode = #tpu.pipeline_mode<synchronous>, transform_indices = @transform_1, window_bounds = array<i64: 9, 256>}, {pipeline_mode = #tpu.pipeline_mode<synchronous>, transform_indices = @transform_2, window_bounds = array<i64: 1, 256>}, {transform_indices = @transform_3, window_bounds = array<i64: 2, 16, 256>}]} {
    %c0 = arith.constant 0 : index
    %c0_0 = arith.constant 0 : index
    %c0_1 = arith.constant 0 : index
    %0 = vector.load %arg1[%c0, %c0_0, %c0_1] : memref<2x16x256xf32, #tpu.memory_space<vmem>>, vector<2x16x256xf32>
    %cst = arith.constant 0.000000e+00 : f32
    %1 = vector.broadcast %cst : f32 to vector<2x1x256xf32>
    %2 = vector.extract_strided_slice %0 {offsets = [0, 0, 0], sizes = [2, 15, 256], strides = [1, 1, 1]} : vector<2x16x256xf32> to vector<2x15x256xf32>
    %3 = tpu.concatenate %1, %2 in 1 : vector<2x1x256xf32>, vector<2x15x256xf32> -> vector<2x16x256xf32>
    %4 = vector.extract_strided_slice %0 {offsets = [0, 1, 0], sizes = [2, 15, 256], strides = [1, 1, 1]} : vector<2x16x256xf32> to vector<2x15x256xf32>
    %5 = tpu.concatenate %4, %1 in 1 : vector<2x15x256xf32>, vector<2x1x256xf32> -> vector<2x16x256xf32>
    %c0_2 = arith.constant 0 : index
    %c0_3 = arith.constant 0 : index
    %6 = vector.load %arg3[%c0_2, %c0_3] : memref<1x256xf32, #tpu.memory_space<vmem>>, vector<1x256xf32>
    %7 = vector.shape_cast %6 : vector<1x256xf32> to vector<256xf32>
    %8 = vector.shape_cast %7 : vector<256xf32> to vector<1x1x256xf32>
    %9 = vector.broadcast %8 : vector<1x1x256xf32> to vector<2x16x256xf32>
    %c16_i32 = arith.constant 16 : i32
    %10 = tpu.dynamic_rotate %3 by %c16_i32 dim 2 : vector<2x16x256xf32>, i32 -> vector<2x16x256xf32>
    %c240_i32 = arith.constant 240 : i32
    %11 = tpu.dynamic_rotate %3 by %c240_i32 dim 2 : vector<2x16x256xf32>, i32 -> vector<2x16x256xf32>
    %c0_4 = arith.constant 0 : index
    %c0_5 = arith.constant 0 : index
    %12 = vector.load %arg2[%c0_4, %c0_5] : memref<9x256xf32, #tpu.memory_space<vmem>>, vector<1x256xf32>
    %13 = vector.shape_cast %12 : vector<1x256xf32> to vector<256xf32>
    %14 = vector.shape_cast %13 : vector<256xf32> to vector<1x1x256xf32>
    %15 = vector.broadcast %14 : vector<1x1x256xf32> to vector<2x16x256xf32>
    %16 = arith.mulf %10, %15 : vector<2x16x256xf32>
    %17 = arith.addf %9, %16 : vector<2x16x256xf32>
    %c1 = arith.constant 1 : index
    %c0_6 = arith.constant 0 : index
    %18 = vector.load %arg2[%c1, %c0_6] : memref<9x256xf32, #tpu.memory_space<vmem>>, vector<1x256xf32>
    %19 = vector.shape_cast %18 : vector<1x256xf32> to vector<256xf32>
    %20 = vector.shape_cast %19 : vector<256xf32> to vector<1x1x256xf32>
    %21 = vector.broadcast %20 : vector<1x1x256xf32> to vector<2x16x256xf32>
    %22 = arith.mulf %3, %21 : vector<2x16x256xf32>
    %23 = arith.addf %17, %22 : vector<2x16x256xf32>
    %c2 = arith.constant 2 : index
    %c0_7 = arith.constant 0 : index
    %24 = vector.load %arg2[%c2, %c0_7] : memref<9x256xf32, #tpu.memory_space<vmem>>, vector<1x256xf32>
    %25 = vector.shape_cast %24 : vector<1x256xf32> to vector<256xf32>
    %26 = vector.shape_cast %25 : vector<256xf32> to vector<1x1x256xf32>
    %27 = vector.broadcast %26 : vector<1x1x256xf32> to vector<2x16x256xf32>
    %28 = arith.mulf %11, %27 : vector<2x16x256xf32>
    %29 = arith.addf %23, %28 : vector<2x16x256xf32>
    %c16_i32_8 = arith.constant 16 : i32
    %30 = tpu.dynamic_rotate %0 by %c16_i32_8 dim 2 : vector<2x16x256xf32>, i32 -> vector<2x16x256xf32>
    %c240_i32_9 = arith.constant 240 : i32
    %31 = tpu.dynamic_rotate %0 by %c240_i32_9 dim 2 : vector<2x16x256xf32>, i32 -> vector<2x16x256xf32>
    %c3 = arith.constant 3 : index
    %c0_10 = arith.constant 0 : index
    %32 = vector.load %arg2[%c3, %c0_10] : memref<9x256xf32, #tpu.memory_space<vmem>>, vector<1x256xf32>
    %33 = vector.shape_cast %32 : vector<1x256xf32> to vector<256xf32>
    %34 = vector.shape_cast %33 : vector<256xf32> to vector<1x1x256xf32>
    %35 = vector.broadcast %34 : vector<1x1x256xf32> to vector<2x16x256xf32>
    %36 = arith.mulf %30, %35 : vector<2x16x256xf32>
    %37 = arith.addf %29, %36 : vector<2x16x256xf32>
    %c4 = arith.constant 4 : index
    %c0_11 = arith.constant 0 : index
    %38 = vector.load %arg2[%c4, %c0_11] : memref<9x256xf32, #tpu.memory_space<vmem>>, vector<1x256xf32>
    %39 = vector.shape_cast %38 : vector<1x256xf32> to vector<256xf32>
    %40 = vector.shape_cast %39 : vector<256xf32> to vector<1x1x256xf32>
    %41 = vector.broadcast %40 : vector<1x1x256xf32> to vector<2x16x256xf32>
    %42 = arith.mulf %0, %41 : vector<2x16x256xf32>
    %43 = arith.addf %37, %42 : vector<2x16x256xf32>
    %c5 = arith.constant 5 : index
    %c0_12 = arith.constant 0 : index
    %44 = vector.load %arg2[%c5, %c0_12] : memref<9x256xf32, #tpu.memory_space<vmem>>, vector<1x256xf32>
    %45 = vector.shape_cast %44 : vector<1x256xf32> to vector<256xf32>
    %46 = vector.shape_cast %45 : vector<256xf32> to vector<1x1x256xf32>
    %47 = vector.broadcast %46 : vector<1x1x256xf32> to vector<2x16x256xf32>
    %48 = arith.mulf %31, %47 : vector<2x16x256xf32>
    %49 = arith.addf %43, %48 : vector<2x16x256xf32>
    %c16_i32_13 = arith.constant 16 : i32
    %50 = tpu.dynamic_rotate %5 by %c16_i32_13 dim 2 : vector<2x16x256xf32>, i32 -> vector<2x16x256xf32>
    %c240_i32_14 = arith.constant 240 : i32
    %51 = tpu.dynamic_rotate %5 by %c240_i32_14 dim 2 : vector<2x16x256xf32>, i32 -> vector<2x16x256xf32>
    %c6 = arith.constant 6 : index
    %c0_15 = arith.constant 0 : index
    %52 = vector.load %arg2[%c6, %c0_15] : memref<9x256xf32, #tpu.memory_space<vmem>>, vector<1x256xf32>
    %53 = vector.shape_cast %52 : vector<1x256xf32> to vector<256xf32>
    %54 = vector.shape_cast %53 : vector<256xf32> to vector<1x1x256xf32>
    %55 = vector.broadcast %54 : vector<1x1x256xf32> to vector<2x16x256xf32>
    %56 = arith.mulf %50, %55 : vector<2x16x256xf32>
    %57 = arith.addf %49, %56 : vector<2x16x256xf32>
    %c7 = arith.constant 7 : index
    %c0_16 = arith.constant 0 : index
    %58 = vector.load %arg2[%c7, %c0_16] : memref<9x256xf32, #tpu.memory_space<vmem>>, vector<1x256xf32>
    %59 = vector.shape_cast %58 : vector<1x256xf32> to vector<256xf32>
    %60 = vector.shape_cast %59 : vector<256xf32> to vector<1x1x256xf32>
    %61 = vector.broadcast %60 : vector<1x1x256xf32> to vector<2x16x256xf32>
    %62 = arith.mulf %5, %61 : vector<2x16x256xf32>
    %63 = arith.addf %57, %62 : vector<2x16x256xf32>
    %c8 = arith.constant 8 : index
    %c0_17 = arith.constant 0 : index
    %64 = vector.load %arg2[%c8, %c0_17] : memref<9x256xf32, #tpu.memory_space<vmem>>, vector<1x256xf32>
    %65 = vector.shape_cast %64 : vector<1x256xf32> to vector<256xf32>
    %66 = vector.shape_cast %65 : vector<256xf32> to vector<1x1x256xf32>
    %67 = vector.broadcast %66 : vector<1x1x256xf32> to vector<2x16x256xf32>
    %68 = arith.mulf %51, %67 : vector<2x16x256xf32>
    %69 = arith.addf %63, %68 : vector<2x16x256xf32>
    %cst_18 = arith.constant 0.000000e+00 : f32
    %70 = vector.broadcast %cst_18 : f32 to vector<2x16x256xf32>
    %71 = arith.maximumf %69, %70 : vector<2x16x256xf32>
    %c0_19 = arith.constant 0 : index
    %c0_20 = arith.constant 0 : index
    %c0_21 = arith.constant 0 : index
    %72 = vector.load %arg4[%c0_19, %c0_20, %c0_21] : memref<2x16x256xf32, #tpu.memory_space<vmem>>, vector<2x16x256xf32>
    tpu.vector_store %arg4[%c0_19, %c0_20, %c0_21], %71 {strides = array<i32>} : memref<2x16x256xf32, #tpu.memory_space<vmem>>, vector<2x16x256xf32>,
    return
  }
  func.func @transform_0(%arg0: i32) -> (i32, i32, i32) {
    %c0_i32 = arith.constant 0 : i32
    %c0_i32_0 = arith.constant 0 : i32
    %c0_i32_1 = arith.constant 0 : i32
    return %arg0, %c0_i32, %c0_i32_0 : i32, i32, i32
  }
  func.func @transform_1(%arg0: i32) -> (i32, i32) {
    %c0_i32 = arith.constant 0 : i32
    %c0_i32_0 = arith.constant 0 : i32
    %c0_i32_1 = arith.constant 0 : i32
    return %c0_i32, %c0_i32_0 : i32, i32
  }
  func.func @transform_2(%arg0: i32) -> (i32, i32) {
    %c0_i32 = arith.constant 0 : i32
    %c0_i32_0 = arith.constant 0 : i32
    %c0_i32_1 = arith.constant 0 : i32
    return %c0_i32, %c0_i32_0 : i32, i32
  }
  func.func @transform_3(%arg0: i32) -> (i32, i32, i32) {
    %c0_i32 = arith.constant 0 : i32
    %c0_i32_0 = arith.constant 0 : i32
    %c0_i32_1 = arith.constant 0 : i32
    return %arg0, %c0_i32, %c0_i32_0 : i32, i32, i32
  }
}

</mosaic_0001>

<bundles_post_ra>
// kernel: tpu_custom_call.1
= control target key start
LH: loop header
LB: loop body
LE: loop exit
PB: predicated region body
PF: predicated region fallthrough
CT: control target
= control target key end

     0   :  { %8 = vsyncpa [#allocation3], 0  ;;  %s1048_s0 = inlined_call_operand.hbm [shape: f32[2,16,256], index: 0, kind: input, shape index: {}]   ;;  %s1049_s1 = inlined_call_operand.hbm [shape: f32[9,256], index: 1, kind: input, shape index: {}]   ;;  %s1050_s2 = inlined_call_operand.vmem [shape: f32[1,256], index: 2, kind: input, shape index: {}]   ;;  %s1051_s3 = inlined_call_operand.hbm [shape: f32[2,16,256], index: 3, kind: output, shape index: {}]  }
   0x1   :  { %9 = vsyncpa [#allocation6], 0 }
   0x2   :  { %10 = vsyncpa [#allocation4], 0  ;;  %s635_s12 = smov [#allocation2]  }
   0x3   :  { %s16_s13 = sshll.u32 %s635_s12, 4  ;;  %s17_s13 = int_to_ptr.vmem [resolvable:$true] %s16_s13 }
   0x4   :  { %s577_s14 = scalar_lea.vmem %s17_s13, 1024  ;;  %p582_p1 = scmp.lt.s32.totalorder %s17_s13, %s17_s13 }
   0x5   :  { %p578_p0 = scmp.ne.s32.totalorder %s17_s13, %s577_s14  ;;  %p583_p2 = scmp.lt.s32.totalorder %s577_s14, %s577_s14 }
   0x7   :  { %p584_p3 = por %p583_p2, %p582_p1 }
   0x9   :  { %p585_p4 = pnand %p584_p3, %p578_p0 }
   0xb   :  { %588 = shalt.err (!%p585_p4)
}
   0xc   :  { %s636_s15 = smov 256   ;;  %s637_s16 = smov 16  }
   0xd   :  { %22 = dma.hbm_to_vmem [thread:$0]  %s1048_s0, 1024, %s17_s13, [#allocation3], %s636_s15, %s636_s15, %s637_s16  }
   0xe   :  { %s638_s19 = smov [#allocation5]  }
   0xf   :  { %s28_s20 = sshll.u32 %s638_s19, 4  ;;  %s29_s20 = int_to_ptr.vmem [resolvable:$true] %s28_s20 }
  0x10   :  { %s597_s21 = scalar_lea.vmem %s29_s20, 512  ;;  %p602_p6 = scmp.lt.s32.totalorder %s29_s20, %s29_s20 }
  0x11   :  { %p598_p5 = scmp.ne.s32.totalorder %s29_s20, %s597_s21  ;;  %p603_p7 = scmp.lt.s32.totalorder %s597_s21, %s597_s21 }
  0x13   :  { %p604_p8 = por %p603_p7, %p602_p6 }
  0x15   :  { %p605_p9 = pnand %p604_p8, %p598_p5 }
  0x17   :  { %608 = shalt.err (!%p605_p9)
}
  0x18   :  { %34 = dma.hbm_to_vmem [thread:$0]  %s1049_s1, 512, %s29_s20, [#allocation6], %s636_s15, %s636_s15, %s637_s16  }
  0x19   :  { %629 = dma.done.wait [#allocation3], 1024  }
  0x1a   :  { %630 = vsyncadd [#allocation3], 4294966272 }
  0x1b   :  { %631 = dma.done.wait [#allocation6], 512  }
  0x1c   :  { %632 = vsyncadd [#allocation6], 4294966784  ;;  %v673_v0 = vld [vmem:[#allocation2 + $0x20] sm:$0xff]  ;;  %vm59_vm0 = vcmask 1040384   ;;  %v679_v4 = vld [vmem:[#allocation2 + $0x30] sm:$0xff]  ;;  %vm84_vm1 = vcmask 1046528   ;;  %v111_v40 = vlaneseq }
  0x1d   :  { %v675_v1 = vld [vmem:[#allocation2] sm:$0xff]  ;;  %v66_v2 = vrot.slane %v673_v0, 7  ;;  %v681_v5 = vld [vmem:[#allocation2 + $0x10] sm:$0xff]  ;;  %v68_v6 = vrot.slane %v679_v4, 7  ;;  %v685_v8 = vld [vmem:[#allocation2 + $0x8] sm:$0xff]  ;;  %v92_v19 = vrot.slane %v679_v4, 1 }
  0x1e   :  { %v60_v3 = vrot.slane %v675_v1, 7  ;;  %v62_v7 = vrot.slane %v681_v5, 7  ;;  %v687_v9 = vld [vmem:[#allocation2 + $0x18] sm:$0xff]  ;;  %v61_v14 = vrot.slane %v685_v8, 7  ;;  %v707_v16 = vld [vmem:[#allocation2 + $0x28] sm:$0xff]  ;;  %v91_v20 = vrot.slane %v673_v0, 1 }
  0x1f   :  { %v690_v10 = vsel %vm59_vm0, 0.0, %v66_v2  ;;  %v700_v12 = vsel %vm59_vm0, %v66_v2, %v68_v6  ;;  %v64_v15 = vrot.slane %v687_v9, 7  ;;  %v709_v17 = vld [vmem:[#allocation2 + $0x38] sm:$0xff]  ;;  %v67_v18 = vrot.slane %v707_v16, 7  ;;  %s639_s0 = smov 112  }
  0x20   :  { %v693_v11 = vsel %vm59_vm0, 0.0, %v60_v3  ;;  %125 = vrot.lane.b32.xlu1 %v690_v10, %s637_s16  ;;  %v703_v13 = vsel %vm59_vm0, %v60_v3, %v62_v7  ;;  %v722_v22 = vsel %vm59_vm0, 0.0, %v61_v14  ;;  %v70_v23 = vrot.slane %v709_v17, 7  ;;  %v202_v42 = vld [vmem:[#allocation5 + $0x1] ss:$8 sm:$0x3] }
  0x21   :  { %121 = vrot.lane.b32.xlu0 %v693_v11, %s637_s16  ;;  %v719_v21 = vsel %vm59_vm0, %v61_v14, %v64_v15  ;;  %v89_v24 = vrot.slane %v687_v9, 1  ;;  %v727_v25 = vsel %vm84_vm1, %v91_v20, %v92_v19  ;;  %v88_v26 = vrot.slane %v685_v8, 1  ;;  %v173_v49 = vld [vmem:[#allocation5] ss:$8 sm:$0x3] }
  0x22   :  { %v95_v27 = vrot.slane %v709_v17, 1  ;;  %v94_v28 = vrot.slane %v707_v16, 1  ;;  %v737_v29 = vsel %vm59_vm0, %v67_v18, %v70_v23  ;;  %v740_v30 = vsel %vm59_vm0, 0.0, %v67_v18  ;;  %v109_v53 = vld [vmem:[%s1050_s2] sm:$0x3]  ;;  %s640_s2 = smov [#allocation7]  }
  0x23   :  { %v743_v31 = vsel %vm84_vm1, %v88_v26, %v89_v24  ;;  %v86_v33 = vrot.slane %v681_v5, 1  ;;  %v85_v34 = vrot.slane %v675_v1, 1  ;;  %v813_v37 = vsel %vm84_vm1, %v92_v19, 0.0  ;;  %s550_s25 = sshll.u32 %s640_s2, 4  ;;  %s551_s25 = int_to_ptr.vmem [resolvable:$true] %s550_s25 }
  0x24   :  { %127 = vrot.lane.b32.xlu1 %v700_v12, %s637_s16  ;;  %v746_v32 = vsel %vm84_vm1, %v94_v28, %v95_v27  ;;  %v820_v38 = vsel %vm84_vm1, %v89_v24, 0.0  ;;  %v827_v39 = vsel %vm84_vm1, %v95_v27, 0.0  ;;  %v112_v41 = vshrl.u32 %v111_v40, 7  ;;  %s609_s26 = scalar_lea.vmem %s551_s25, 1024  ;;  %p614_p11 = scmp.lt.s32.totalorder %s551_s25, %s551_s25 }
  0x25   :  { %123 = vrot.lane.b32.xlu0 %v703_v13, %s637_s16  ;;  %v803_v35 = vsel %vm84_vm1, %v86_v33, 0.0  ;;  %v806_v36 = vsel %vm84_vm1, %v85_v34, %v86_v33  ;;  %v851_v46 = vand.u32 127, %v111_v40  ;;  %p610_p10 = scmp.ne.s32.totalorder %s551_s25, %s609_s26  ;;  %p615_p12 = scmp.lt.s32.totalorder %s609_s26, %s609_s26 }
  0x26   :  { %v849_v45 = vsub.s32 0, %v112_v41  ;;  %v853_v47 = vsub.s32 1, %v112_v41 }
  0x27   :  { %vm139_vm2 = vcmp.lt.s32.totalorder %v851_v46, 16  ;;  %vm164_vm3 = vcmp.lt.s32.totalorder %v851_v46, 112  ;;  %p616_p13 = por %p615_p12, %p614_p11 }
  0x28   :  { %131 = vrot.lane.b32.xlu1 %v719_v21, %s637_s16  ;;  %v207_v48 = vrot.slane %v202_v42, %v849_v45  ;;  %v211_v50 = vrot.slane %v202_v42, %v853_v47  ;;  %v178_v54 = vrot.slane %v173_v49, %v849_v45  ;;  %v182_v55 = vrot.slane %v173_v49, %v853_v47 }
  0x29   :  { %129 = vrot.lane.b32.xlu0 %v722_v22, %s637_s16  ;;  %v114_v60 = vrot.slane %v109_v53, %v849_v45  ;;  %v118_v61 = vrot.slane %v109_v53, %v853_v47  ;;  %p617_p0 = pnand %p616_p13, %p610_p10 }
  0x2a   :  { %v218_v56 = vmul.f32 %v207_v48, %v690_v10  ;;  %v214_v57 = vmul.f32 %v207_v48, %v693_v11  ;;  %v220_v58 = vmul.f32 %v207_v48, %v700_v12  ;;  %v215_v59 = vmul.f32 %v211_v50, %v722_v22 }
  0x2b   :  { %v216_v15 = vmul.f32 %v207_v48, %v703_v13  ;;  %v217_v18 = vmul.f32 %v211_v50, %v719_v21  ;;  %v221_v19 = vmul.f32 %v211_v50, %v737_v29  ;;  %v219_v20 = vmul.f32 %v211_v50, %v740_v30 }
  0x2c   :  { %135 = vrot.lane.b32.xlu1 %v737_v29, %s637_s16 }
  0x2d   :  { %133 = vrot.lane.b32.xlu0 %v740_v30, %s637_s16 }
  0x30   :  { %150 = vrot.lane.b32.xlu1 %v703_v13, %s639_s0 }
  0x31   :  { %148 = vrot.lane.b32.xlu0 %v693_v11, %s639_s0 }
  0x34   :  { %154 = vrot.lane.b32.xlu1 %v700_v12, %s639_s0 }
  0x35   :  { %152 = vrot.lane.b32.xlu0 %v690_v10, %s639_s0 }
  0x38   :  { %158 = vrot.lane.b32.xlu1 %v719_v21, %s639_s0 }
  0x39   :  { %156 = vrot.lane.b32.xlu0 %v722_v22, %s639_s0 }
  0x3c   :  { %162 = vrot.lane.b32.xlu1 %v737_v29, %s639_s0 }
  0x3d   :  { %160 = vrot.lane.b32.xlu0 %v740_v30, %s639_s0 }
  0x40   :  { %261 = vrot.lane.b32.xlu1 %v681_v5, %s637_s16 }
  0x41   :  { %259 = vrot.lane.b32.xlu0 %v675_v1, %s637_s16 }
  0x44   :  { %265 = vrot.lane.b32.xlu1 %v679_v4, %s637_s16 }
  0x45   :  { %263 = vrot.lane.b32.xlu0 %v673_v0, %s637_s16 }
  0x48   :  { %269 = vrot.lane.b32.xlu1 %v687_v9, %s637_s16 }
  0x49   :  { %267 = vrot.lane.b32.xlu0 %v685_v8, %s637_s16 }
  0x4c   :  { %273 = vrot.lane.b32.xlu1 %v709_v17, %s637_s16 }
  0x4d   :  { %271 = vrot.lane.b32.xlu0 %v707_v16, %s637_s16 }
  0x50   :  { %285 = vrot.lane.b32.xlu1 %v681_v5, %s639_s0 }
  0x51   :  { %283 = vrot.lane.b32.xlu0 %v675_v1, %s639_s0 }
  0x54   :  { %289 = vrot.lane.b32.xlu1 %v679_v4, %s639_s0 }
  0x55   :  { %287 = vrot.lane.b32.xlu0 %v673_v0, %s639_s0 }
  0x58   :  { %293 = vrot.lane.b32.xlu1 %v687_v9, %s639_s0 }
  0x59   :  { %291 = vrot.lane.b32.xlu0 %v685_v8, %s639_s0 }
  0x5c   :  { %297 = vrot.lane.b32.xlu1 %v709_v17, %s639_s0 }
  0x5d   :  { %295 = vrot.lane.b32.xlu0 %v707_v16, %s639_s0 }
  0x60   :  { %396 = vrot.lane.b32.xlu1 %v803_v35, %s637_s16 }
  0x61   :  { %394 = vrot.lane.b32.xlu0 %v806_v36, %s637_s16 }
  0x64   :  { %400 = vrot.lane.b32.xlu1 %v813_v37, %s637_s16 }
  0x65   :  { %398 = vrot.lane.b32.xlu0 %v727_v25, %s637_s16 }
  0x68   :  { %404 = vrot.lane.b32.xlu1 %v820_v38, %s637_s16 }
  0x69   :  { %402 = vrot.lane.b32.xlu0 %v743_v31, %s637_s16 }
  0x6c   :  { %408 = vrot.lane.b32.xlu1 %v827_v39, %s637_s16 }
  0x6d   :  { %406 = vrot.lane.b32.xlu0 %v746_v32, %s637_s16 }
  0x70   :  { %420 = vrot.lane.b32.xlu1 %v803_v35, %s639_s0 }
  0x71   :  { %418 = vrot.lane.b32.xlu0 %v806_v36, %s639_s0 }
  0x74   :  { %424 = vrot.lane.b32.xlu1 %v813_v37, %s639_s0 }
  0x75   :  { %422 = vrot.lane.b32.xlu0 %v727_v25, %s639_s0 }
  0x78   :  { %428 = vrot.lane.b32.xlu1 %v820_v38, %s639_s0 }
  0x79   :  { %426 = vrot.lane.b32.xlu0 %v743_v31, %s639_s0 }
  0x7c   :  { %432 = vrot.lane.b32.xlu1 %v827_v39, %s639_s0 }
  0x7d   :  { %430 = vrot.lane.b32.xlu0 %v746_v32, %s639_s0 }
  0x92   :  { %v126_v43 = vpop.permute.xlu1 %125 }
  0x93   :  { %v122_v44 = vpop.permute.xlu0 %121 }
  0x96   :  { %v128_v51 = vpop.permute.xlu1 %127 }
  0x97   :  { %v124_v52 = vpop.permute.xlu0 %123 }
  0x9a   :  { %v132_v62 = vpop.permute.xlu1 %131 }
  0x9b   :  { %v130_v63 = vpop.permute.xlu0 %129  ;;  %v141_v2 = vsel %vm139_vm2, %v124_v52, %v132_v62  ;;  %v145_v3 = vsel %vm139_vm2, %v132_v62, %v124_v52 }
  0x9c   :  { %v140_v6 = vsel %vm139_vm2, %v122_v44, %v130_v63  ;;  %v144_v7 = vsel %vm139_vm2, %v130_v63, %v122_v44  ;;  %v187_v10 = vmul.f32 %v178_v54, %v145_v3  ;;  %v188_v11 = vmul.f32 %v182_v55, %v141_v2 }
  0x9d   :  { %v185_v12 = vmul.f32 %v178_v54, %v144_v7  ;;  %v186_v14 = vmul.f32 %v182_v55, %v140_v6 }
  0x9e   :  { %v195_v22 = vadd.f32 %v187_v10, %v114_v60  ;;  %v196_v23 = vadd.f32 %v188_v11, %v118_v61  ;;  %v136_v27 = vpop.permute.xlu1 %135 }
  0x9f   :  { %v193_v24 = vadd.f32 %v185_v12, %v114_v60  ;;  %v194_v26 = vadd.f32 %v186_v14, %v118_v61  ;;  %v134_v28 = vpop.permute.xlu0 %133  ;;  %v143_v33 = vsel %vm139_vm2, %v128_v51, %v136_v27  ;;  %v147_v34 = vsel %vm139_vm2, %v136_v27, %v128_v51 }
  0xa0   :  { %v142_v13 = vsel %vm139_vm2, %v126_v43, %v134_v28  ;;  %v146_v21 = vsel %vm139_vm2, %v134_v28, %v126_v43  ;;  %v191_v29 = vmul.f32 %v178_v54, %v147_v34  ;;  %v192_v30 = vmul.f32 %v182_v55, %v143_v33 }
  0xa1   :  { %v189_v40 = vmul.f32 %v178_v54, %v146_v21  ;;  %v190_v41 = vmul.f32 %v182_v55, %v142_v13  ;;  %v224_v42 = vadd.f32 %v216_v15, %v195_v22  ;;  %v225_v44 = vadd.f32 %v217_v18, %v196_v23  ;;  %v231_v54 = vld [vmem:[#allocation5 + $0x2] ss:$8 sm:$0x3] }
  0xa2   :  { %v222_v48 = vadd.f32 %v214_v57, %v193_v24  ;;  %v223_v49 = vadd.f32 %v215_v59, %v194_v26  ;;  %v199_v50 = vadd.f32 %v191_v29, %v114_v60  ;;  %v200_v52 = vadd.f32 %v192_v30, %v118_v61  ;;  %v151_v63 = vpop.permute.xlu1 %150  ;;  %v337_v57 = vld [vmem:[#allocation5 + $0x4] ss:$8 sm:$0x3] }
  0xa3   :  { %v197_v53 = vadd.f32 %v189_v40, %v114_v60  ;;  %v198_v62 = vadd.f32 %v190_v41, %v118_v61  ;;  %v149_v51 = vpop.permute.xlu0 %148  ;;  %v236_v59 = vrot.slane %v231_v54, %v849_v45  ;;  %v240_v60 = vrot.slane %v231_v54, %v853_v47  ;;  %v308_v61 = vld [vmem:[#allocation5 + $0x3] ss:$8 sm:$0x3] }
  0xa4   :  { %v228_v2 = vadd.f32 %v220_v58, %v199_v50  ;;  %v229_v3 = vadd.f32 %v221_v19, %v200_v52  ;;  %v342_v22 = vrot.slane %v337_v57, %v849_v45  ;;  %v346_v23 = vrot.slane %v337_v57, %v853_v47 }
  0xa5   :  { %v226_v6 = vadd.f32 %v218_v56, %v197_v53  ;;  %v227_v7 = vadd.f32 %v219_v20, %v198_v62  ;;  %v313_v24 = vrot.slane %v308_v61, %v849_v45  ;;  %v317_v26 = vrot.slane %v308_v61, %v853_v47 }
  0xa6   :  { %v155_v10 = vpop.permute.xlu1 %154  ;;  %v351_v50 = vmul.f32 %v342_v22, %v681_v5  ;;  %v352_v52 = vmul.f32 %v346_v23, %v687_v9  ;;  %v349_v53 = vmul.f32 %v342_v22, %v675_v1  ;;  %v350_v62 = vmul.f32 %v346_v23, %v685_v8 }
  0xa7   :  { %v153_v43 = vpop.permute.xlu0 %152 }
  0xaa   :  { %v159_v11 = vpop.permute.xlu1 %158 }
  0xab   :  { %v157_v12 = vpop.permute.xlu0 %156  ;;  %v166_v58 = vsel %vm164_vm3, %v151_v63, %v159_v11  ;;  %v170_v56 = vsel %vm164_vm3, %v159_v11, %v151_v63  ;;  %v355_v63 = vmul.f32 %v342_v22, %v679_v4  ;;  %v354_v11 = vmul.f32 %v346_v23, %v707_v16 }
  0xac   :  { %v165_v15 = vsel %vm164_vm3, %v149_v51, %v157_v12  ;;  %v169_v18 = vsel %vm164_vm3, %v157_v12, %v149_v51  ;;  %v245_v27 = vmul.f32 %v236_v59, %v166_v58  ;;  %v246_v28 = vmul.f32 %v240_v60, %v170_v56 }
  0xad   :  { %v243_v33 = vmul.f32 %v236_v59, %v165_v15  ;;  %v244_v34 = vmul.f32 %v240_v60, %v169_v18  ;;  %v356_v51 = vmul.f32 %v346_v23, %v709_v17 }
  0xae   :  { %v163_v55 = vpop.permute.xlu1 %162  ;;  %v254_v5 = vadd.f32 %v246_v28, %v225_v44 }
  0xaf   :  { %v161_v14 = vpop.permute.xlu0 %160  ;;  %v168_v13 = vsel %vm164_vm3, %v155_v10, %v163_v55  ;;  %v172_v21 = vsel %vm164_vm3, %v163_v55, %v155_v10  ;;  %v353_v10 = vmul.f32 %v342_v22, %v673_v0  ;;  %v251_v57 = vadd.f32 %v243_v33, %v222_v48 }
  0xb0   :  { %v167_v29 = vsel %vm164_vm3, %v153_v43, %v161_v14  ;;  %v171_v30 = vsel %vm164_vm3, %v161_v14, %v153_v43  ;;  %v249_v12 = vmul.f32 %v236_v59, %v168_v13  ;;  %v250_v43 = vmul.f32 %v240_v60, %v172_v21 }
  0xb1   :  { %v247_v54 = vmul.f32 %v236_v59, %v167_v29  ;;  %v248_v55 = vmul.f32 %v240_v60, %v171_v30  ;;  %v253_v14 = vadd.f32 %v245_v27, %v224_v42  ;;  %v252_v9 = vadd.f32 %v244_v34, %v223_v49 }
  0xb2   :  { %v262_v19 = vpop.permute.xlu1 %261  ;;  %v257_v48 = vadd.f32 %v249_v12, %v228_v2  ;;  %v258_v49 = vadd.f32 %v250_v43, %v229_v3 }
  0xb3   :  { %v260_v20 = vpop.permute.xlu0 %259  ;;  %v255_v60 = vadd.f32 %v247_v54, %v226_v6  ;;  %v256_v58 = vadd.f32 %v248_v55, %v227_v7 }
  0xb6   :  { %v266_v40 = vpop.permute.xlu1 %265 }
  0xb7   :  { %v264_v41 = vpop.permute.xlu0 %263 }
  0xba   :  { %v270_v61 = vpop.permute.xlu1 %269 }
  0xbb   :  { %v268_v1 = vpop.permute.xlu0 %267  ;;  %v276_v8 = vsel %vm139_vm2, %v262_v19, %v270_v61  ;;  %v280_v4 = vsel %vm139_vm2, %v270_v61, %v262_v19 }
  0xbc   :  { %v275_v0 = vsel %vm139_vm2, %v260_v20, %v268_v1  ;;  %v279_v16 = vsel %vm139_vm2, %v268_v1, %v260_v20  ;;  %v322_v17 = vmul.f32 %v313_v24, %v280_v4  ;;  %v323_v59 = vmul.f32 %v317_v26, %v276_v8  ;;  %v472_v1 = vld [vmem:[#allocation5 + $0x7] ss:$8 sm:$0x3] }
  0xbd   :  { %v320_v42 = vmul.f32 %v313_v24, %v279_v16  ;;  %v321_v44 = vmul.f32 %v317_v26, %v275_v0  ;;  %v477_v8 = vrot.slane %v472_v1, %v849_v45  ;;  %v366_v0 = vld [vmem:[#allocation5 + $0x5] ss:$8 sm:$0x3]  ;;  %v443_v16 = vld [vmem:[#allocation5 + $0x6] ss:$8 sm:$0x3] }
  0xbe   :  { %v330_v56 = vadd.f32 %v322_v17, %v253_v14  ;;  %v331_v15 = vadd.f32 %v323_v59, %v254_v5  ;;  %v274_v23 = vpop.permute.xlu1 %273 }
  0xbf   :  { %v328_v18 = vadd.f32 %v320_v42, %v251_v57  ;;  %v329_v22 = vadd.f32 %v321_v44, %v252_v9  ;;  %v272_v19 = vpop.permute.xlu0 %271  ;;  %v278_v27 = vsel %vm139_vm2, %v266_v40, %v274_v23  ;;  %v282_v20 = vsel %vm139_vm2, %v274_v23, %v266_v40 }
  0xc0   :  { %v277_v28 = vsel %vm139_vm2, %v264_v41, %v272_v19  ;;  %v281_v2 = vsel %vm139_vm2, %v272_v19, %v264_v41  ;;  %v326_v3 = vmul.f32 %v313_v24, %v282_v20  ;;  %v327_v6 = vmul.f32 %v317_v26, %v278_v27 }
  0xc1   :  { %v324_v7 = vmul.f32 %v313_v24, %v281_v2  ;;  %v325_v33 = vmul.f32 %v317_v26, %v277_v28  ;;  %v936_v34 = vadd.f32 %v351_v50, %v330_v56  ;;  %v938_v13 = vadd.f32 %v352_v52, %v331_v15 }
  0xc2   :  { %v940_v21 = vadd.f32 %v349_v53, %v328_v18  ;;  %v942_v29 = vadd.f32 %v350_v62, %v329_v22  ;;  %v334_v30 = vadd.f32 %v326_v3, %v257_v48  ;;  %v335_v40 = vadd.f32 %v327_v6, %v258_v49  ;;  %v286_v54 = vpop.permute.xlu1 %285 }
  0xc3   :  { %v332_v12 = vadd.f32 %v324_v7, %v255_v60  ;;  %v333_v43 = vadd.f32 %v325_v33, %v256_v58  ;;  %v284_v55 = vpop.permute.xlu0 %283  ;;  %v963_v42 = vmul.f32 %v477_v8, %v813_v37  ;;  %v966_v44 = vmul.f32 %v477_v8, %v727_v25 }
  0xc4   :  { %v944_v14 = vadd.f32 %v355_v63, %v334_v30  ;;  %v946_v41 = vadd.f32 %v356_v51, %v335_v40  ;;  %v954_v51 = vrot.slane %v472_v1, %v853_v47  ;;  %v371_v48 = vrot.slane %v366_v0, %v849_v45 }
  0xc5   :  { %v948_v24 = vadd.f32 %v353_v10, %v332_v12  ;;  %v950_v26 = vadd.f32 %v354_v11, %v333_v43  ;;  %v957_v10 = vmul.f32 %v477_v8, %v803_v35  ;;  %v960_v11 = vmul.f32 %v477_v8, %v806_v36 }
  0xc6   :  { %v290_v50 = vpop.permute.xlu1 %289  ;;  %v375_v49 = vrot.slane %v366_v0, %v853_v47  ;;  %v487_v25 = vmul.f32 %v954_v51, %v820_v38  ;;  %v485_v58 = vmul.f32 %v954_v51, %v743_v31  ;;  %v448_v56 = vrot.slane %v443_v16, %v849_v45 }
  0xc7   :  { %v288_v52 = vpop.permute.xlu0 %287  ;;  %v452_v15 = vrot.slane %v443_v16, %v853_v47 }
  0xca   :  { %v294_v53 = vpop.permute.xlu1 %293 }
  0xcb   :  { %v292_v5 = vpop.permute.xlu0 %291  ;;  %v300_v35 = vsel %vm164_vm3, %v286_v54, %v294_v53  ;;  %v304_v36 = vsel %vm164_vm3, %v294_v53, %v286_v54 }
  0xcc   :  { %v299_v60 = vsel %vm164_vm3, %v284_v55, %v292_v5  ;;  %v303_v37 = vsel %vm164_vm3, %v292_v5, %v284_v55  ;;  %v380_v20 = vmul.f32 %v371_v48, %v300_v35  ;;  %v381_v31 = vmul.f32 %v375_v49, %v304_v36  ;;  %v501_v36 = vld [vmem:[#allocation5 + $0x10] ss:$8 sm:$0x3] }
  0xcd   :  { %v378_v28 = vmul.f32 %v371_v48, %v299_v60  ;;  %v379_v2 = vmul.f32 %v375_v49, %v303_v37 }
  0xce   :  { %v298_v62 = vpop.permute.xlu1 %297  ;;  %v388_v1 = vadd.f32 %v380_v20, %v936_v34  ;;  %v389_v8 = vadd.f32 %v381_v31, %v938_v13 }
  0xcf   :  { %v296_v57 = vpop.permute.xlu0 %295  ;;  %v302_v3 = vsel %vm164_vm3, %v290_v50, %v298_v62  ;;  %v306_v6 = vsel %vm164_vm3, %v298_v62, %v290_v50  ;;  %v386_v0 = vadd.f32 %v378_v28, %v940_v21 }
  0xd0   :  { %v301_v7 = vsel %vm164_vm3, %v288_v52, %v296_v57  ;;  %v305_v33 = vsel %vm164_vm3, %v296_v57, %v288_v52  ;;  %v385_v52 = vmul.f32 %v375_v49, %v306_v6 }
  0xd1   :  { %v382_v57 = vmul.f32 %v371_v48, %v301_v7 }
  0xd2   :  { %v397_v9 = vpop.permute.xlu1 %396  ;;  %v393_v34 = vadd.f32 %v385_v52, %v946_v41 }
  0xd3   :  { %v395_v61 = vpop.permute.xlu0 %394  ;;  %v390_v13 = vadd.f32 %v382_v57, %v948_v24 }
  0xd6   :  { %v401_v4 = vpop.permute.xlu1 %400 }
  0xd7   :  { %v399_v63 = vpop.permute.xlu0 %398 }
  0xda   :  { %v405_v17 = vpop.permute.xlu1 %404 }
  0xdb   :  { %v403_v59 = vpop.permute.xlu0 %402  ;;  %v411_v18 = vsel %vm139_vm2, %v397_v9, %v405_v17  ;;  %v415_v22 = vsel %vm139_vm2, %v405_v17, %v397_v9  ;;  %v384_v9 = vmul.f32 %v371_v48, %v302_v3 }
  0xdc   :  { %v410_v23 = vsel %vm139_vm2, %v395_v61, %v403_v59  ;;  %v414_v19 = vsel %vm139_vm2, %v403_v59, %v395_v61  ;;  %v457_v30 = vmul.f32 %v448_v56, %v415_v22  ;;  %v458_v40 = vmul.f32 %v452_v15, %v411_v18 }
  0xdd   :  { %v455_v12 = vmul.f32 %v448_v56, %v414_v19  ;;  %v456_v43 = vmul.f32 %v452_v15, %v410_v23  ;;  %v383_v61 = vmul.f32 %v375_v49, %v305_v33  ;;  %v392_v49 = vadd.f32 %v384_v9, %v944_v14 }
  0xde   :  { %v409_v38 = vpop.permute.xlu1 %408  ;;  %v466_v60 = vadd.f32 %v458_v40, %v389_v8  ;;  %v510_v23 = vrot.slane %v501_v36, %v853_v47 }
  0xdf   :  { %v407_v27 = vpop.permute.xlu0 %406  ;;  %v413_v54 = vsel %vm139_vm2, %v401_v4, %v409_v38  ;;  %v417_v55 = vsel %vm139_vm2, %v409_v38, %v401_v4  ;;  %v387_v4 = vadd.f32 %v379_v2, %v942_v29  ;;  %v463_v37 = vadd.f32 %v455_v12, %v386_v0 }
  0xe0   :  { %v412_v53 = vsel %vm139_vm2, %v399_v63, %v407_v27  ;;  %v416_v50 = vsel %vm139_vm2, %v407_v27, %v399_v63  ;;  %v461_v16 = vmul.f32 %v448_v56, %v417_v55  ;;  %v462_v17 = vmul.f32 %v452_v15, %v413_v54 }
  0xe1   :  { %v459_v59 = vmul.f32 %v448_v56, %v416_v50  ;;  %v460_v35 = vmul.f32 %v452_v15, %v412_v53  ;;  %v465_v63 = vadd.f32 %v457_v30, %v388_v1  ;;  %v464_v18 = vadd.f32 %v456_v43, %v387_v4 }
  0xe2   :  { %v421_v5 = vpop.permute.xlu1 %420  ;;  %v391_v21 = vadd.f32 %v383_v61, %v950_v26  ;;  %v491_v29 = vmul.f32 %v954_v51, %v827_v39  ;;  %v489_v56 = vmul.f32 %v954_v51, %v746_v32  ;;  %v506_v15 = vrot.slane %v501_v36, %v849_v45 }
  0xe3   :  { %v419_v62 = vpop.permute.xlu0 %418  ;;  %v469_v19 = vadd.f32 %v461_v16, %v392_v49  ;;  %v470_v38 = vadd.f32 %v462_v17, %v393_v34  ;;  %v467_v27 = vadd.f32 %v459_v59, %v390_v13  ;;  %v494_v41 = vadd.f32 %v957_v10, %v465_v63 }
  0xe4   :  { %v468_v14 = vadd.f32 %v460_v35, %v391_v21  ;;  %v495_v24 = vadd.f32 %v487_v25, %v466_v60  ;;  %v492_v26 = vadd.f32 %v960_v11, %v463_v37  ;;  %v493_v31 = vadd.f32 %v485_v58, %v464_v18 }
  0xe5   :  { %v498_v11 = vadd.f32 %v963_v42, %v469_v19  ;;  %v499_v58 = vadd.f32 %v491_v29, %v470_v38  ;;  %v496_v3 = vadd.f32 %v966_v44, %v467_v27 }
  0xe6   :  { %v425_v22 = vpop.permute.xlu1 %424  ;;  %v497_v6 = vadd.f32 %v489_v56, %v468_v14 }
  0xe7   :  { %v423_v48 = vpop.permute.xlu0 %422 }
  0xea   :  { %v429_v20 = vpop.permute.xlu1 %428 }
  0xeb   :  { %v427_v28 = vpop.permute.xlu0 %426  ;;  %v435_v39 = vsel %vm164_vm3, %v421_v5, %v429_v20  ;;  %v439_v32 = vsel %vm164_vm3, %v429_v20, %v421_v5 }
  0xec   :  { %v434_v45 = vsel %vm164_vm3, %v419_v62, %v427_v28  ;;  %v438_v47 = vsel %vm164_vm3, %v427_v28, %v419_v62  ;;  %v515_v51 = vmul.f32 %v506_v15, %v435_v39  ;;  %v516_v2 = vmul.f32 %v510_v23, %v439_v32 }
  0xed   :  { %v513_v10 = vmul.f32 %v506_v15, %v434_v45  ;;  %v514_v25 = vmul.f32 %v510_v23, %v438_v47 }
  0xee   :  { %v523_v7 = vadd.f32 %v515_v51, %v494_v41  ;;  %v524_v33 = vadd.f32 %v516_v2, %v495_v24  ;;  %v433_v12 = vpop.permute.xlu1 %432 }
  0xef   :  { %v521_v30 = vadd.f32 %v513_v10, %v492_v26  ;;  %v522_v40 = vadd.f32 %v514_v25, %v493_v31  ;;  %v431_v43 = vpop.permute.xlu0 %430  ;;  %v437_v54 = vsel %vm164_vm3, %v425_v22, %v433_v12  ;;  %v441_v55 = vsel %vm164_vm3, %v433_v12, %v425_v22 }
  0xf0   :  { %v436_v53 = vsel %vm164_vm3, %v423_v48, %v431_v43  ;;  %v440_v42 = vsel %vm164_vm3, %v431_v43, %v423_v48  ;;  %v531_v44 = vmax.f32 %v523_v7, 0.0  ;;  %v532_v50 = vmax.f32 %v524_v33, 0.0 }
  0xf1   :  { %v529_v5 = vmax.f32 %v521_v30, 0.0  ;;  %v530_v62 = vmax.f32 %v522_v40, 0.0  ;;  %v519_v9 = vmul.f32 %v506_v15, %v437_v54  ;;  %v520_v52 = vmul.f32 %v510_v23, %v441_v55 }
  0xf2   :  { %v517_v57 = vmul.f32 %v506_v15, %v436_v53  ;;  %v518_v61 = vmul.f32 %v510_v23, %v440_v42  ;;  %539 = vst [vmem:[#allocation7 + $0x10] sm:$0xff] %v531_v44  ;;  %540 = vst [vmem:[#allocation7 + $0x18] sm:$0xff] %v532_v50 }
  0xf3   :  { %537 = vst [vmem:[#allocation7] sm:$0xff] %v529_v5  ;;  %538 = vst [vmem:[#allocation7 + $0x8] sm:$0xff] %v530_v62  ;;  %v527_v1 = vadd.f32 %v519_v9, %v498_v11  ;;  %v528_v8 = vadd.f32 %v520_v52, %v499_v58 }
  0xf4   :  { %v525_v0 = vadd.f32 %v517_v57, %v496_v3  ;;  %v526_v4 = vadd.f32 %v518_v61, %v497_v6 }
  0xf5   :  { %v535_v46 = vmax.f32 %v527_v1, 0.0  ;;  %v536_v16 = vmax.f32 %v528_v8, 0.0 }
  0xf6   :  { %v533_v17 = vmax.f32 %v525_v0, 0.0  ;;  %v534_v59 = vmax.f32 %v526_v4, 0.0 }
  0xf7   :  { %543 = vst [vmem:[#allocation7 + $0x30] sm:$0xff] %v535_v46  ;;  %544 = vst [vmem:[#allocation7 + $0x38] sm:$0xff] %v536_v16 }
  0xf8   :  { %541 = vst [vmem:[#allocation7 + $0x20] sm:$0xff] %v533_v17  ;;  %542 = vst [vmem:[#allocation7 + $0x28] sm:$0xff] %v534_v59 }
  0xf9   :  { %620 = shalt.err (!%p617_p0)
}
  0xfa   :  { %556 = dma.vmem_to_hbm [thread:$0]  %s551_s25, 1024, %s1051_s3, [#allocation4], %s636_s15, %s636_s15, %s637_s16  }
  0xfb   :  { %633 = dma.done.wait [#allocation4], 1024  }
  0xfc   :  { %634 = vsyncadd [#allocation4], 4294966272 }
  0xfd   :  { %560 = vsyncpa [#allocation3], 1 }
  0xfe   :  { %561 = vsyncpa [#allocation6], 1 }
  0xff   :  { %562 = vsyncpa [#allocation4], 1 }

</bundles_post_ra>
